<compile_context>
chip_gen: v7x
topology: tpu7x:2x2x1
jax: 0.10.0
libtpu: 0.0.40
codegen_flags: <defaults>
</compile_context>

<pallas_src>
import jax
import jax.numpy as jnp
from jax import lax
from jax.experimental import pallas as pl
from jax.experimental.pallas import tpu as pltpu


def _round_up(n, m):
    return ((n + m - 1) // m) * m


def _jnp_forward(x, w1, b1, w2, b2):
    """Plain-XLA path (tiny batches, ragged tail rows)."""
    h = jnp.tanh(jnp.dot(x.astype(jnp.float32), w1.astype(jnp.float32))
                 + b1.reshape(1, -1).astype(jnp.float32))
    return (jnp.dot(h, w2.reshape(-1, 1).astype(jnp.float32))
            + b2.reshape(1, 1).astype(jnp.float32))


def control_variate_kernel(x_ref, w1_ref, b1_ref, w2t_ref, b2_ref, o_ref):
    # lin1 on the MXU over a lane-dense packed tile; f32 accumulation.
    h = jnp.dot(x_ref[...], w1_ref[...], preferred_element_type=jnp.float32)
    # bias + tanh in f32 on VPU/EUP (v5e-safe); packing means ~g x fewer vregs here.
    h = jnp.tanh(h + b1_ref[...])
    # Feed lin2 at its (narrow) compute dtype; accumulation stays f32.
    h = h.astype(w2t_ref.dtype)
    # lin2 in A @ B^T form: (g, g*H) . (block_r, g*H)^T -> (g, block_r).
    # Output is already lane-dense (batch on the 128-lane axis) -> unmasked stores.
    out = lax.dot_general(
        w2t_ref[...], h,
        dimension_numbers=(((1,), (1,)), ((), ())),
        preferred_element_type=jnp.float32,
    )
    # b2 is a scalar in SMEM; broadcast-add, full-width store.
    o_ref[...] = (out + b2_ref[0]).astype(o_ref.dtype)


def control_variate(x, w1, b1, w2, b2, *, block_rows=None,
                    lin2_dtype=jnp.bfloat16, force_kernel=False,
                    min_pallas_batch=1024):
    """x: (B, psi_dim) -> (B, 1).  Matches lin2(tanh(lin1(x)))."""
    B, D = x.shape
    H = w1.shape[1]

    # Tiny batches: single-step pallas_call is pure launch overhead; let XLA fuse it.
    if B < min_pallas_batch and not force_kernel:
        return _jnp_forward(x, w1, b1, w2, b2)

    # ---- lane packing: fold g consecutive batch rows into the 128-lane axis ----
    g = max(1, 128 // D)
    B_main = (B // g) * g
    if B_main == 0:
        return _jnp_forward(x, w1, b1, w2, b2)
    tail = B - B_main

    # Stream x at its HBM dtype; bf16 only if the caller already stores bf16.
    lin1_dtype = jnp.bfloat16 if x.dtype == jnp.bfloat16 else jnp.float32
    x_main = x if tail == 0 else x[:B_main]
    x_main = x_main.astype(lin1_dtype)

    Dp, Hp, R = g * D, g * H, B_main // g
    # Contiguous row-major regroup: g rows -> one packed (dense-lane) row.
    x_packed = x_main.reshape(R, Dp)

    eye = jnp.eye(g, dtype=jnp.float32)
    w1p = jnp.kron(eye, w1.astype(jnp.float32)).astype(lin1_dtype)           # (g*D, g*H)
    b1p = jnp.tile(b1.reshape(1, H).astype(jnp.float32), (1, g))             # (1, g*H)
    w2t = jnp.kron(eye, w2.reshape(1, H).astype(jnp.float32)).astype(lin2_dtype)  # (g, g*H)
    b2s = b2.reshape(1).astype(jnp.float32)                                  # SMEM scalar

    # ---- tile sizing (packed rows): big-but-bounded, VMEM-budgeted ----
    x_item = jnp.dtype(lin1_dtype).itemsize
    min_sub = 8 * max(1, 4 // x_item)                      # 8 (f32) / 16 (bf16) sublanes
    lane_pad = lambda n: _round_up(n, 128)
    bytes_per_row = (2 * lane_pad(Dp) * x_item             # x double buffer
                     + lane_pad(Hp) * 4                    # h (f32)
                     + lane_pad(Hp) * jnp.dtype(lin2_dtype).itemsize)  # h cast for lin2
    VMEM_BUDGET = 20 * 1024 * 1024                         # headroom under requested 32 MiB
    max_block_r = max(min_sub, (VMEM_BUDGET // bytes_per_row) // min_sub * min_sub)
    max_block_r = min(max_block_r, 8192)                   # 2-4 MiB payload/step is plenty

    if block_rows is None:
        block_r = min(_round_up(R, min_sub), max_block_r)
        # Keep >= 2 grid steps when there's enough work so both v7x TCs stream HBM.
        if R >= 2 * 128 and block_r >= R:
            block_r = max(128, _round_up(pl.cdiv(R, 2), 128))
    else:
        block_r = min(_round_up(block_rows, min_sub), _round_up(R, min_sub), max_block_r)

    num_blocks = pl.cdiv(R, block_r)
    if num_blocks > 1:
        block_r = _round_up(block_r, 128)                  # lane-dense output tiles
        num_blocks = pl.cdiv(R, block_r)
    padded_R = num_blocks * block_r

    cost = pl.CostEstimate(
        flops=2 * R * Dp * Hp + 2 * R * Hp * g,
        transcendentals=R * Hp,
        bytes_accessed=(R * Dp * x_item + g * padded_R * 4
                        + Dp * Hp * x_item + (Hp + g * Hp + 1) * 4),
    )

    out = pl.pallas_call(
        control_variate_kernel,
        out_shape=jax.ShapeDtypeStruct((g, padded_R), jnp.float32),
        grid_spec=pltpu.PrefetchScalarGridSpec(
            num_scalar_prefetch=0,
            grid=(num_blocks,),
            in_specs=[
                pl.BlockSpec((block_r, Dp), lambda i: (i, 0)),      # x: streamed, dense lanes
                pl.BlockSpec((Dp, Hp), lambda i: (0, 0)),           # w1 (block-diag): resident
                pl.BlockSpec((1, Hp), lambda i: (0, 0)),            # b1: resident
                pl.BlockSpec((g, Hp), lambda i: (0, 0)),            # w2^T (block-diag): resident
                pl.BlockSpec(memory_space=pltpu.MemorySpace.SMEM),  # b2: scalar in SMEM
            ],
            # Lane-dense output: one (g, block_r) tile per grid step.
            out_specs=pl.BlockSpec((g, block_r), lambda i: (0, i)),
        ),
        compiler_params=pltpu.CompilerParams(
            dimension_semantics=("parallel",),
            # v5e's scoped default is 16 MiB; 32 MiB is safe on v5e/v6e/v7x and covers
            # the budgeted tiles above.
            vmem_limit_bytes=32 * 1024 * 1024,
        ),
        cost_estimate=cost,
    )(x_packed, w1p, b1p, w2t, b2s)

    # Un-interleave: out[i, r] is the result for original row r*g + i.  Padded packed
    # rows (stale VMEM) only contaminate their own (sliced-off) columns.
    out_main = out[:, :R].T.reshape(B_main, 1)
    if tail:
        out_tail = _jnp_forward(x[B_main:], w1, b1, w2, b2)
        out_main = jnp.concatenate([out_main, out_tail.astype(out_main.dtype)], axis=0)
    return out_main


def init_params(key, psi_dim, hidden=10, out=1, dtype=jnp.float32):
    """Deterministic init mirroring nn.Linear's default U(-1/sqrt(fan_in), 1/sqrt(fan_in))."""
    k1, k2, k3, k4 = jax.random.split(key, 4)
    bound1 = 1.0 / (psi_dim ** 0.5)
    bound2 = 1.0 / (hidden ** 0.5)
    w1 = jax.random.uniform(k1, (psi_dim, hidden), dtype, -bound1, bound1)
    b1 = jax.random.uniform(k2, (hidden,), dtype, -bound1, bound1)
    w2 = jax.random.uniform(k3, (hidden, out), dtype, -bound2, bound2)
    b2 = jax.random.uniform(k4, (out,), dtype, -bound2, bound2)
    return w1, b1, w2, b2


if __name__ == "__main__":
    psi_dim = 32

    key = jax.random.PRNGKey(0)
    kx, kp, kx2, kx3 = jax.random.split(key, 4)
    w1, b1, w2, b2 = init_params(kp, psi_dim)

    def ref_fn(xv):
        return jnp.dot(jnp.tanh(jnp.dot(xv, w1) + b1), w2) + b2

    # 1) small batch (B=8), forced through the Pallas kernel (single grid step),
    #    f32 lin2 for a tight tolerance.
    x_small = jax.random.normal(kx, (8, psi_dim), jnp.float32)
    out1 = jax.block_until_ready(
        control_variate(x_small, w1, b1, w2, b2,
                        force_kernel=True, lin2_dtype=jnp.float32))
    assert out1.shape == (8, 1)
    assert jnp.allclose(out1, ref_fn(x_small), atol=1e-4, rtol=1e-4)

    # 2) larger ragged batch: lane-packed multi-step grid + ragged tail rows.
    B2 = 4102  # not a multiple of g=4, not a multiple of 128
    x_big = jax.random.normal(kx2, (B2, psi_dim), jnp.float32)
    out2 = jax.block_until_ready(control_variate(x_big, w1, b1, w2, b2))   # bf16 lin2 default
    assert out2.shape == (B2, 1)
    assert jnp.allclose(out2, ref_fn(x_big), atol=2e-2, rtol=2e-2)

    out2f = jax.block_until_ready(
        control_variate(x_big, w1, b1, w2, b2, lin2_dtype=jnp.float32))    # f32 lin2 path
    assert jnp.allclose(out2f, ref_fn(x_big), atol=1e-4, rtol=1e-4)

    # 3) tiny-batch fallback path (plain jnp below the pallas threshold).
    x_tiny = jax.random.normal(kx3, (3, psi_dim), jnp.float32)
    out3 = jax.block_until_ready(control_variate(x_tiny, w1, b1, w2, b2))
    assert out3.shape == (3, 1)
    assert jnp.allclose(out3, ref_fn(x_tiny), atol=1e-5)

    print("KERNEL_OK")
</pallas_src>

<mosaic_0001>
module attributes {stable_mosaic.version = 11 : i64} {
  func.func @control_variate_kernel(%arg0: i32, %arg1: memref<8x128xf32, #tpu.memory_space<vmem>>, %arg2: memref<128x40xf32, #tpu.memory_space<vmem>>, %arg3: memref<1x40xf32, #tpu.memory_space<vmem>>, %arg4: memref<4x40xf32, #tpu.memory_space<vmem>>, %arg5: memref<1xf32, #tpu.memory_space<smem>>, %arg6: memref<4x8xf32, #tpu.memory_space<vmem>>) attributes {dimension_semantics = [#tpu.dimension_semantics<parallel>], iteration_bounds = array<i64: 1>, scalar_prefetch = 0 : i64, scratch_operands = 0 : i64, tpu.core_type = #tpu.core_type<tc>, window_params = [{transform_indices = @transform_0, window_bounds = array<i64: 8, 128>}, {pipeline_mode = #tpu.pipeline_mode<synchronous>, transform_indices = @transform_1, window_bounds = array<i64: 128, 40>}, {pipeline_mode = #tpu.pipeline_mode<synchronous>, transform_indices = @transform_2, window_bounds = array<i64: 1, 40>}, {pipeline_mode = #tpu.pipeline_mode<synchronous>, transform_indices = @transform_3, window_bounds = array<i64: 4, 40>}, {transform_indices = @transform_4, window_bounds = array<i64: 1>}, {transform_indices = @transform_5, window_bounds = array<i64: 4, 8>}]} {
    %c0 = arith.constant 0 : index
    %c0_0 = arith.constant 0 : index
    %0 = vector.load %arg1[%c0, %c0_0] : memref<8x128xf32, #tpu.memory_space<vmem>>, vector<8x128xf32>
    %c0_1 = arith.constant 0 : index
    %c0_2 = arith.constant 0 : index
    %1 = vector.load %arg2[%c0_1, %c0_2] : memref<128x40xf32, #tpu.memory_space<vmem>>, vector<128x40xf32>
    %cst = arith.constant dense<0.000000e+00> : vector<8x40xf32>
    %2 = tpu.matmul %0, %1, %cst {dimension_numbers = #tpu.dot_dimension_numbers<[1], [0], [0], [1], [0, 0, 1, 1], [], []>} : vector<8x128xf32>, vector<128x40xf32>, vector<8x40xf32> -> vector<8x40xf32>
    %c0_3 = arith.constant 0 : index
    %c0_4 = arith.constant 0 : index
    %3 = vector.load %arg3[%c0_3, %c0_4] : memref<1x40xf32, #tpu.memory_space<vmem>>, vector<1x40xf32>
    %4 = vector.broadcast %3 : vector<1x40xf32> to vector<8x40xf32>
    %5 = arith.addf %2, %4 : vector<8x40xf32>
    %6 = math.tanh %5 : vector<8x40xf32>
    %c0_5 = arith.constant 0 : index
    %c0_6 = arith.constant 0 : index
    %7 = vector.load %arg4[%c0_5, %c0_6] : memref<4x40xf32, #tpu.memory_space<vmem>>, vector<4x40xf32>
    %cst_7 = arith.constant dense<0.000000e+00> : vector<4x8xf32>
    %8 = tpu.matmul %7, %6, %cst_7 {dimension_numbers = #tpu.dot_dimension_numbers<[1], [1], [0], [0], [0, 0, 1, 0], [], []>} : vector<4x40xf32>, vector<8x40xf32>, vector<4x8xf32> -> vector<4x8xf32>
    %c0_8 = arith.constant 0 : index
    %9 = memref.load %arg5[%c0_8] : memref<1xf32, #tpu.memory_space<smem>>
    %10 = vector.broadcast %9 : f32 to vector<4x8xf32>
    %11 = arith.addf %8, %10 : vector<4x8xf32>
    %c0_9 = arith.constant 0 : index
    %c0_10 = arith.constant 0 : index
    %12 = vector.load %arg6[%c0_9, %c0_10] : memref<4x8xf32, #tpu.memory_space<vmem>>, vector<4x8xf32>
    tpu.vector_store %arg6[%c0_9, %c0_10], %11 {strides = array<i32>} : memref<4x8xf32, #tpu.memory_space<vmem>>, vector<4x8xf32>,
    return
  }
  func.func @transform_0(%arg0: i32) -> (i32, i32) {
    %c0_i32 = arith.constant 0 : i32
    %c0_i32_0 = arith.constant 0 : i32
    return %arg0, %c0_i32 : i32, i32
  }
  func.func @transform_1(%arg0: i32) -> (i32, i32) {
    %c0_i32 = arith.constant 0 : i32
    %c0_i32_0 = arith.constant 0 : i32
    %c0_i32_1 = arith.constant 0 : i32
    return %c0_i32, %c0_i32_0 : i32, i32
  }
  func.func @transform_2(%arg0: i32) -> (i32, i32) {
    %c0_i32 = arith.constant 0 : i32
    %c0_i32_0 = arith.constant 0 : i32
    %c0_i32_1 = arith.constant 0 : i32
    return %c0_i32, %c0_i32_0 : i32, i32
  }
  func.func @transform_3(%arg0: i32) -> (i32, i32) {
    %c0_i32 = arith.constant 0 : i32
    %c0_i32_0 = arith.constant 0 : i32
    %c0_i32_1 = arith.constant 0 : i32
    return %c0_i32, %c0_i32_0 : i32, i32
  }
  func.func @transform_4(%arg0: i32) -> i32 {
    %c0_i32 = arith.constant 0 : i32
    %c0_i32_0 = arith.constant 0 : i32
    return %c0_i32 : i32
  }
  func.func @transform_5(%arg0: i32) -> (i32, i32) {
    %c0_i32 = arith.constant 0 : i32
    %c0_i32_0 = arith.constant 0 : i32
    return %c0_i32, %arg0 : i32, i32
  }
}

</mosaic_0001>

<bundles_post_ra>
// kernel: tpu_custom_call.1
= control target key start
LH: loop header
LB: loop body
LE: loop exit
PB: predicated region body
PF: predicated region fallthrough
CT: control target
= control target key end

     0   :  { %v329_v3 = vmov 0.0|0.0   ;;  %vm330_vm0 = vmmov 0   ;;  %v331_v6 = vmov 0.0   ;;  %s435_s0 = inlined_call_operand.vmem [shape: f32[2,128], index: 0, kind: input, shape index: {}]   ;;  %s436_s1 = inlined_call_operand.vmem [shape: f32[128,40], index: 1, kind: input, shape index: {}]   ;;  %s437_s2 = inlined_call_operand.vmem [shape: f32[1,40], index: 2, kind: input, shape index: {}]   ;;  %s438_s3 = inlined_call_operand.vmem [shape: f32[4,40], index: 3, kind: input, shape index: {}]   ;;  %s439_s4 = inlined_call_operand.<no memory space> [shape: f32[1], index: 4, kind: input, shape index: {}]   ;;  %s440_s5 = inlined_call_operand.hbm [shape: f32[4,8], index: 5, kind: output, shape index: {}]  }
   0x1   :  { %v23_v0 = vld [vmem:[%s436_s1] sm:$0xff]  ;;  %v24_v1 = vld [vmem:[%s436_s1 + $0x8] sm:$0xff]  ;;  %v25_v2 = vld [vmem:[%s436_s1 + $0x10] sm:$0xff]  ;;  %275 = vmatprep.subr.bf16.mxu0 %v329_v3  ;;  %267 = vmatprep.mubr.msk.f32.mxu0 %vm330_vm0, %v331_v6 }
   0x2   :  { %v276_v4 = vpack.c.bf16 %v24_v1, %v23_v0  ;;  %v26_v5 = vld [vmem:[%s436_s1 + $0x18] sm:$0xff]  ;;  %270 = vmatprep.subr.mxu1 %v331_v6  ;;  %272 = vmatprep.mubr.msk.f32.mxu1 %vm330_vm0, %v331_v6  ;;  %v27_v8 = vld [vmem:[%s436_s1 + $0x20] sm:$0xff]  ;;  %v28_v9 = vld [vmem:[%s436_s1 + $0x28] sm:$0xff] }
   0x3   :  { %v279_v7 = vpack.c.bf16 %v26_v5, %v25_v2 }
   0x4   :  { %277 = vmatpush3.bf16.msra.mxu0 %v276_v4 }
   0x5   :  { %278 = vmatprep.subr.bf16.mxu0 %v329_v3 }
   0x6   :  { %11 = vsyncpa [#allocation4], 0  ;;  %v282_v10 = vpack.c.bf16 %v28_v9, %v27_v8  ;;  %v29_v11 = vld [vmem:[%s436_s1 + $0x30] sm:$0xff]  ;;  %v30_v12 = vld [vmem:[%s436_s1 + $0x38] sm:$0xff]  ;;  %vm120_vm1 = vcmask 326656   ;;  %v119_v33 = vstv %s439_s4  ;;  %vm197_vm2 = vcmask 60416  }
   0x7   :  { %v285_v13 = vpack.c.bf16 %v30_v12, %v29_v11  ;;  %v31_v14 = vld [vmem:[%s436_s1 + $0x40] sm:$0xff]  ;;  %v32_v15 = vld [vmem:[%s436_s1 + $0x48] sm:$0xff]  ;;  %v33_v17 = vld [vmem:[%s436_s1 + $0x50] sm:$0xff] }
   0x8   :  { %280 = vmatpush3.bf16.msra.mxu0 %v279_v7  ;;  %v288_v16 = vpack.c.bf16 %v32_v15, %v31_v14  ;;  %v34_v18 = vld [vmem:[%s436_s1 + $0x58] sm:$0xff]  ;;  %v35_v20 = vld [vmem:[%s436_s1 + $0x60] sm:$0xff]  ;;  %v36_v21 = vld [vmem:[%s436_s1 + $0x68] sm:$0xff] }
   0x9   :  { %281 = vmatprep.subr.bf16.mxu0 %v329_v3  ;;  %v291_v19 = vpack.c.bf16 %v34_v18, %v33_v17  ;;  %v294_v22 = vpack.c.bf16 %v36_v21, %v35_v20  ;;  %v37_v23 = vld [vmem:[%s436_s1 + $0x70] sm:$0xff]  ;;  %v38_v24 = vld [vmem:[%s436_s1 + $0x78] sm:$0xff]  ;;  %v22_v26 = vld [vmem:[%s435_s0] sm:$0xff]  ;;  %s332_s0 = smov [#allocation3]  }
   0xa   :  { %v297_v25 = vpack.c.bf16 %v38_v24, %v37_v23  ;;  %v213_v27 = vld [vmem:[%s437_s2] ss:$0 sm:$0xff]  ;;  %s205_s7 = sshll.u32 %s332_s0, 4  ;;  %s206_s7 = int_to_ptr.vmem [resolvable:$true] %s205_s7 }
   0xb   :  { %v117_v32 = vld [vmem:[%s438_s3] sm:$0xf]  ;;  %s305_s2 = scalar_lea.vmem %s206_s7, 64  ;;  %p310_p1 = scmp.lt.s32.totalorder %s206_s7, %s206_s7 }
   0xc   :  { %283 = vmatpush3.bf16.msra.mxu0 %v282_v10  ;;  %p306_p0 = scmp.ne.s32.totalorder %s206_s7, %s305_s2  ;;  %p311_p2 = scmp.lt.s32.totalorder %s305_s2, %s305_s2 }
   0xd   :  { %284 = vmatprep.subr.bf16.mxu0 %v329_v3 }
   0xe   :  { %p312_p3 = por %p311_p2, %p310_p1 }
  0x10   :  { %286 = vmatpush3.bf16.msra.mxu0 %v285_v13  ;;  %p313_p4 = pnand %p312_p3, %p306_p0 }
  0x11   :  { %287 = vmatprep.subr.bf16.mxu0 %v329_v3 }
  0x14   :  { %289 = vmatpush3.bf16.msra.mxu0 %v288_v16 }
  0x15   :  { %290 = vmatprep.subr.bf16.mxu0 %v329_v3 }
  0x18   :  { %292 = vmatpush3.bf16.msra.mxu0 %v291_v19 }
  0x19   :  { %293 = vmatprep.subr.bf16.mxu0 %v329_v3 }
  0x1c   :  { %295 = vmatpush3.bf16.msra.mxu0 %v294_v22 }
  0x1d   :  { %296 = vmatprep.subr.bf16.mxu0 %v329_v3 }
  0x20   :  { %298 = vmatpush3.bf16.msra.mxu0 %v297_v25 }
  0x23   :  { %268 = vmatmul.mubr.f32.vlgmr.msra.gmra.mrb[0].mxu0 %v22_v26 }
  0xf6   :  { %v112_v28 = vpop.f32.mrb[0].mxu0 }
  0xf7   :  { %v113_v29 = vadd.f32 %v213_v27, %v112_v28  ;;  %v269_v30 = vpop.f32.mrb[1].mxu0 }
  0xf9   :  { %303 = vtanh.f32 %v113_v29 }
 0x103   :  { %v304_v31 = vpop.eup %303 }
 0x104   :  { %271 = vmatpush3.xpose.msk.msra.mxu1 %vm120_vm1, %v304_v31 }
 0x107   :  { %273 = vmatmul.mubr.msk.f32.vlgmr.msra.gmra.mrb[0].mxu1 %vm120_vm1, %v117_v32 }
 0x1da   :  { %v193_v34 = vpop.f32.mrb[0].mxu1 }
 0x1db   :  { %v194_v35 = vadd.f32 %v193_v34, %v119_v33  ;;  %v274_v36 = vpop.f32.mrb[1].mxu1 }
 0x1dd   :  { %198 = vst.msk [vmem:[#allocation3] sm:$0xf] %vm197_vm2, %v194_v35 }
 0x1de   :  { %316 = shalt.err (!%p313_p4)
}
 0x1df   :  { %s317_s9 = scalar_lea.hbm %s440_s5, 64 }
 0x1e0   :  { %p318_p5 = scmp.ne.s32.totalorder %s440_s5, %s317_s9  ;;  %p321_p6 = scmp.lt.u32.totalorder %s317_s9, %s440_s5 }
 0x1e2   :  { %p323_p7 = pnand %p321_p6, %p318_p5 }
 0x1e4   :  { %326 = shalt.err (!%p323_p7)
}
 0x1e5   :  { %208 = dma.vmem_to_hbm [thread:$0]  %s206_s7, 64, %s440_s5, [#allocation4]  }
 0x1e6   :  { %327 = dma.done.wait [#allocation4], 64  }
 0x1e7   :  { %328 = vsyncadd [#allocation4], 4294967232 }
 0x1e8   :  { %212 = vsyncpa [#allocation4], 1 }

</bundles_post_ra>
